<compile_context>
chip_gen: v7x
topology: tpu7x:2x2x1
jax: 0.10.0
libtpu: 0.0.40
codegen_flags: <defaults>
</compile_context>

<pallas_src>
import functools

import jax
import jax.numpy as jnp
from jax.experimental import pallas as pl
from jax.experimental.pallas import tpu as pltpu

LANE = 128           # TPU lane width (last dim)
_MIB = 1024 * 1024


def _round_up(x, m):
    return ((x + m - 1) // m) * m


# -----------------------------------------------------------------------------
# Fused kernel: all layers for one batch tile.
#   refs = (x_ref, w0, b0, w1, b1, ..., wN, bN, o_ref)
# Intermediate activations never leave vregs/VMEM; only the final output tile is
# written back to HBM.
# -----------------------------------------------------------------------------
def _mlp_fused_kernel(x_ref, *refs, num_layers, activation):
    o_ref = refs[-1]
    param_refs = refs[:-1]

    h = x_ref[...].astype(jnp.float32)                # (tile_b, Din)
    for i in range(num_layers):                       # small, statically unrolled
        w_ref = param_refs[2 * i]                     # (Din_i, Dout_i) f32 or bf16
        b = param_refs[2 * i + 1][...].astype(jnp.float32)   # (1, Dout_i) broadcasts
        # MXU matmul in the weights' storage dtype, f32 accumulation.
        h = jnp.dot(h.astype(w_ref.dtype), w_ref[...],
                    preferred_element_type=jnp.float32) + b
        if i < num_layers - 1:
            h = jnp.maximum(h, 0.0) if activation == "relu" else jnp.tanh(h)
    o_ref[...] = h.astype(o_ref.dtype)


# -----------------------------------------------------------------------------
# Wrapper: tile the batch, keep weights VMEM-resident, call the fused kernel.
# -----------------------------------------------------------------------------
def mlp_forward(params, x, activation="relu", *, batch_tile=256,
                mxu_dtype=jnp.float32, vmem_cap_bytes=64 * _MIB):
    """Fused forward pass of the MLP.

    params: list of (w, b) with w: (Din, Dout), b: (Dout,), float32.
    x: (batch, input_dim) float32.
    mxu_dtype: storage/compute dtype for the weights (f32 exact; bf16 for the
      v6e/v7x MXU fast path, f32 accumulation either way).
    """
    batch, input_dim = x.shape
    num_layers = len(params)
    output_dim = params[-1][0].shape[1]

    # Hidden dims are padded to the 128-lane width (lane-dense intermediate
    # matmuls); input and final output dims stay natural (full-dim blocks are
    # legal), so x and the output never pay an HBM pad/slice round trip.
    out_dims = [w.shape[1] for w, _ in params]
    out_dims_pad = [_round_up(d, LANE) for d in out_dims[:-1]] + [out_dims[-1]]
    in_dims_pad = [input_dim] + out_dims_pad[:-1]

    # Batch tiling: one fat tile when the batch fits; otherwise `batch_tile`-row
    # tiles (>=2 grid steps -> "parallel" axis shards across v7x's two TCs).
    if batch <= batch_tile:
        tile_b, batch_pad = batch, batch
    else:
        tile_b = batch_tile
        batch_pad = _round_up(batch, tile_b)

    x_in = x
    if batch_pad != batch:  # only pads rows, and only when batch % tile != 0
        x_in = jnp.zeros((batch_pad, input_dim), x.dtype).at[:batch].set(x)

    # Pad / cast the parameters (tiny one-time arrays; in a real model do this
    # once at load time rather than per forward call). Zero padding is exact.
    w_dtype = jnp.dtype(mxu_dtype)
    flat_params = []
    in_specs = [pl.BlockSpec((tile_b, input_dim), lambda i: (i, 0))]
    for li, (w, b) in enumerate(params):
        din_p, dout_p = in_dims_pad[li], out_dims_pad[li]
        w_p = (jnp.zeros((din_p, dout_p), w_dtype)
               .at[: w.shape[0], : w.shape[1]].set(w.astype(w_dtype)))
        b_p = jnp.zeros((1, dout_p), jnp.float32).at[0, : b.shape[0]].set(b)
        flat_params.extend([w_p, b_p])
        # Resident weights/biases: constant block index every grid step, and
        # single-buffered (double buffering a never-changing block wastes VMEM).
        in_specs.append(pl.BlockSpec((din_p, dout_p), lambda i: (0, 0),
                                     pipeline_mode=pl.Buffered(1)))
        in_specs.append(pl.BlockSpec((1, dout_p), lambda i: (0, 0),
                                     pipeline_mode=pl.Buffered(1)))

    # ---- VMEM budget: resident weights + pipelined activation tiles ----------
    weight_bytes = sum(in_dims_pad[i] * out_dims_pad[i] * w_dtype.itemsize
                       + out_dims_pad[i] * 4 for i in range(num_layers))
    x_tile_bytes = 2 * tile_b * input_dim * 4          # double-buffered input tile
    out_tile_bytes = 2 * tile_b * output_dim * 4       # double-buffered output tile
    interm_bytes = 2 * tile_b * max(out_dims_pad) * 4  # live intermediate activations
    vmem_budget = weight_bytes + x_tile_bytes + out_tile_bytes + interm_bytes + 2 * _MIB
    if vmem_budget > vmem_cap_bytes:
        # TODO(synk): weight-streaming fallback (per-layer Dout grid with an f32
        # accumulator, or pltpu.emit_pipeline over weight tiles) when the weights
        # do not fit VMEM-resident (e.g. a single f32 4096x4096 layer on v7x).
        raise ValueError(
            f"MLP residency budget {vmem_budget / _MIB:.1f} MiB exceeds the "
            f"{vmem_cap_bytes / _MIB:.0f} MiB VMEM cap; use a streaming variant.")
    vmem_limit = int(min(max(vmem_budget, 32 * _MIB), vmem_cap_bytes))

    # ---- Advisory cost estimate for the surrounding XLA schedule -------------
    flops = 2 * batch_pad * sum(in_dims_pad[i] * out_dims_pad[i]
                                for i in range(num_layers))
    transcendentals = (batch_pad * sum(out_dims_pad[:-1])
                       if activation != "relu" else 0)
    bytes_accessed = (x_in.size * x_in.dtype.itemsize
                      + sum(int(p.size) * p.dtype.itemsize for p in flat_params)
                      + batch_pad * output_dim * 4)
    cost = pl.CostEstimate(flops=flops, transcendentals=transcendentals,
                           bytes_accessed=bytes_accessed)

    kernel = functools.partial(
        _mlp_fused_kernel, num_layers=num_layers, activation=activation)

    out = pl.pallas_call(
        kernel,
        out_shape=jax.ShapeDtypeStruct((batch_pad, output_dim), x.dtype),
        grid=(batch_pad // tile_b,),
        in_specs=in_specs,
        out_specs=pl.BlockSpec((tile_b, output_dim), lambda i: (i, 0)),
        compiler_params=pltpu.CompilerParams(
            dimension_semantics=("parallel",),
            vmem_limit_bytes=vmem_limit,
        ),
        cost_estimate=cost,
    )(x_in, *flat_params)

    return out if batch_pad == batch else out[:batch]


# -----------------------------------------------------------------------------
# Parameter init mirroring nn.Linear's default U(-1/sqrt(fan_in), +1/sqrt(fan_in)).
# Weights kept as (in, out) so the kernel computes y = x @ W + b.
# -----------------------------------------------------------------------------
def init_mlp_params(key, input_dim, hidden_dims, output_dim):
    dims = [input_dim] + list(hidden_dims) + [output_dim]
    params = []
    for i in range(len(dims) - 1):
        key, kw, kb = jax.random.split(key, 3)
        fan_in, fan_out = dims[i], dims[i + 1]
        bound = 1.0 / jnp.sqrt(fan_in)
        w = jax.random.uniform(kw, (fan_in, fan_out), jnp.float32, -bound, bound)
        b = jax.random.uniform(kb, (fan_out,), jnp.float32, -bound, bound)
        params.append((w, b))
    return params


if __name__ == "__main__":
    batch = 256          # fits one fat tile -> single grid step
    input_dim = 32
    hidden_dims = [64, 48]
    output_dim = 16

    key = jax.random.PRNGKey(0)
    key, kx = jax.random.split(key)
    x = jax.random.normal(kx, (batch, input_dim), jnp.float32)
    params = init_mlp_params(key, input_dim, hidden_dims, output_dim)

    # Plain-JAX references.
    def ref_fwd(xv, act):
        h = xv
        for i, (w, b) in enumerate(params):
            h = h @ w + b
            if i < len(params) - 1:
                h = jnp.maximum(h, 0.0) if act == "relu" else jnp.tanh(h)
        return h

    # ReLU path, exact f32.
    out = jax.block_until_ready(mlp_forward(params, x, activation="relu"))
    ref = ref_fwd(x, "relu")
    assert out.shape == (batch, output_dim)
    assert jnp.allclose(out, ref, atol=1e-4, rtol=1e-4), \
        float(jnp.max(jnp.abs(out - ref)))

    # Tanh path, exact f32.
    out_t = jax.block_until_ready(mlp_forward(params, x, activation="tanh"))
    ref_t = ref_fwd(x, "tanh")
    assert jnp.allclose(out_t, ref_t, atol=1e-4, rtol=1e-4)

    # Multi-tile batch path (grid of fat tiles, batch not a tile multiple).
    key, kxb = jax.random.split(key)
    xb = jax.random.normal(kxb, (600, input_dim), jnp.float32)
    out_b = jax.block_until_ready(
        mlp_forward(params, xb, activation="relu", batch_tile=256))
    ref_b = ref_fwd(xb, "relu")
    assert out_b.shape == (600, output_dim)
    assert jnp.allclose(out_b, ref_b, atol=1e-4, rtol=1e-4)

    # bf16 MXU path (v6e/v7x lever); validated against the f32 ref with a loose
    # tolerance since bf16 weights are intentionally not bit-exact.
    out_bf = jax.block_until_ready(
        mlp_forward(params, x, activation="relu", mxu_dtype=jnp.bfloat16))
    assert jnp.allclose(out_bf, ref, atol=1e-1, rtol=1e-1)

    print("KERNEL_OK")
</pallas_src>

<mosaic_0001>
module attributes {stable_mosaic.version = 11 : i64} {
  func.func @_mlp_fused_kernel(%arg0: i32, %arg1: memref<256x32xf32, #tpu.memory_space<vmem>>, %arg2: memref<32x128xf32, #tpu.memory_space<vmem>>, %arg3: memref<1x128xf32, #tpu.memory_space<vmem>>, %arg4: memref<128x128xf32, #tpu.memory_space<vmem>>, %arg5: memref<1x128xf32, #tpu.memory_space<vmem>>, %arg6: memref<128x16xf32, #tpu.memory_space<vmem>>, %arg7: memref<1x16xf32, #tpu.memory_space<vmem>>, %arg8: memref<256x16xf32, #tpu.memory_space<vmem>>) attributes {dimension_semantics = [#tpu.dimension_semantics<parallel>], iteration_bounds = array<i64: 1>, scalar_prefetch = 0 : i64, scratch_operands = 0 : i64, tpu.core_type = #tpu.core_type<tc>, window_params = [{transform_indices = @transform_0, window_bounds = array<i64: 256, 32>}, {pipeline_mode = #tpu.pipeline_mode<synchronous>, transform_indices = @transform_1, window_bounds = array<i64: 32, 128>}, {pipeline_mode = #tpu.pipeline_mode<synchronous>, transform_indices = @transform_2, window_bounds = array<i64: 1, 128>}, {pipeline_mode = #tpu.pipeline_mode<synchronous>, transform_indices = @transform_3, window_bounds = array<i64: 128, 128>}, {pipeline_mode = #tpu.pipeline_mode<synchronous>, transform_indices = @transform_4, window_bounds = array<i64: 1, 128>}, {pipeline_mode = #tpu.pipeline_mode<synchronous>, transform_indices = @transform_5, window_bounds = array<i64: 128, 16>}, {pipeline_mode = #tpu.pipeline_mode<synchronous>, transform_indices = @transform_6, window_bounds = array<i64: 1, 16>}, {transform_indices = @transform_7, window_bounds = array<i64: 256, 16>}]} {
    %c0 = arith.constant 0 : index
    %c0_0 = arith.constant 0 : index
    %0 = vector.load %arg1[%c0, %c0_0] : memref<256x32xf32, #tpu.memory_space<vmem>>, vector<256x32xf32>
    %c0_1 = arith.constant 0 : index
    %c0_2 = arith.constant 0 : index
    %1 = vector.load %arg3[%c0_1, %c0_2] : memref<1x128xf32, #tpu.memory_space<vmem>>, vector<1x128xf32>
    %c0_3 = arith.constant 0 : index
    %c0_4 = arith.constant 0 : index
    %2 = vector.load %arg2[%c0_3, %c0_4] : memref<32x128xf32, #tpu.memory_space<vmem>>, vector<32x128xf32>
    %cst = arith.constant dense<0.000000e+00> : vector<256x128xf32>
    %3 = tpu.matmul %0, %2, %cst {dimension_numbers = #tpu.dot_dimension_numbers<[1], [0], [0], [1], [0, 0, 1, 1], [], []>} : vector<256x32xf32>, vector<32x128xf32>, vector<256x128xf32> -> vector<256x128xf32>
    %4 = vector.broadcast %1 : vector<1x128xf32> to vector<256x128xf32>
    %5 = arith.addf %3, %4 : vector<256x128xf32>
    %cst_5 = arith.constant 0.000000e+00 : f32
    %6 = vector.broadcast %cst_5 : f32 to vector<256x128xf32>
    %7 = arith.maximumf %5, %6 : vector<256x128xf32>
    %c0_6 = arith.constant 0 : index
    %c0_7 = arith.constant 0 : index
    %8 = vector.load %arg5[%c0_6, %c0_7] : memref<1x128xf32, #tpu.memory_space<vmem>>, vector<1x128xf32>
    %c0_8 = arith.constant 0 : index
    %c0_9 = arith.constant 0 : index
    %9 = vector.load %arg4[%c0_8, %c0_9] : memref<128x128xf32, #tpu.memory_space<vmem>>, vector<128x128xf32>
    %cst_10 = arith.constant dense<0.000000e+00> : vector<256x128xf32>
    %10 = tpu.matmul %7, %9, %cst_10 {dimension_numbers = #tpu.dot_dimension_numbers<[1], [0], [0], [1], [0, 0, 1, 1], [], []>} : vector<256x128xf32>, vector<128x128xf32>, vector<256x128xf32> -> vector<256x128xf32>
    %11 = vector.broadcast %8 : vector<1x128xf32> to vector<256x128xf32>
    %12 = arith.addf %10, %11 : vector<256x128xf32>
    %cst_11 = arith.constant 0.000000e+00 : f32
    %13 = vector.broadcast %cst_11 : f32 to vector<256x128xf32>
    %14 = arith.maximumf %12, %13 : vector<256x128xf32>
    %c0_12 = arith.constant 0 : index
    %c0_13 = arith.constant 0 : index
    %15 = vector.load %arg7[%c0_12, %c0_13] : memref<1x16xf32, #tpu.memory_space<vmem>>, vector<1x16xf32>
    %c0_14 = arith.constant 0 : index
    %c0_15 = arith.constant 0 : index
    %16 = vector.load %arg6[%c0_14, %c0_15] : memref<128x16xf32, #tpu.memory_space<vmem>>, vector<128x16xf32>
    %cst_16 = arith.constant dense<0.000000e+00> : vector<256x16xf32>
    %17 = tpu.matmul %14, %16, %cst_16 {dimension_numbers = #tpu.dot_dimension_numbers<[1], [0], [0], [1], [0, 0, 1, 1], [], []>} : vector<256x128xf32>, vector<128x16xf32>, vector<256x16xf32> -> vector<256x16xf32>
    %18 = vector.broadcast %15 : vector<1x16xf32> to vector<256x16xf32>
    %19 = arith.addf %17, %18 : vector<256x16xf32>
    %c0_17 = arith.constant 0 : index
    %c0_18 = arith.constant 0 : index
    %20 = vector.load %arg8[%c0_17, %c0_18] : memref<256x16xf32, #tpu.memory_space<vmem>>, vector<256x16xf32>
    tpu.vector_store %arg8[%c0_17, %c0_18], %19 {strides = array<i32>} : memref<256x16xf32, #tpu.memory_space<vmem>>, vector<256x16xf32>,
    return
  }
  func.func @transform_0(%arg0: i32) -> (i32, i32) {
    %c0_i32 = arith.constant 0 : i32
    %c0_i32_0 = arith.constant 0 : i32
    return %arg0, %c0_i32 : i32, i32
  }
  func.func @transform_1(%arg0: i32) -> (i32, i32) {
    %c0_i32 = arith.constant 0 : i32
    %c0_i32_0 = arith.constant 0 : i32
    %c0_i32_1 = arith.constant 0 : i32
    return %c0_i32, %c0_i32_0 : i32, i32
  }
  func.func @transform_2(%arg0: i32) -> (i32, i32) {
    %c0_i32 = arith.constant 0 : i32
    %c0_i32_0 = arith.constant 0 : i32
    %c0_i32_1 = arith.constant 0 : i32
    return %c0_i32, %c0_i32_0 : i32, i32
  }
  func.func @transform_3(%arg0: i32) -> (i32, i32) {
    %c0_i32 = arith.constant 0 : i32
    %c0_i32_0 = arith.constant 0 : i32
    %c0_i32_1 = arith.constant 0 : i32
    return %c0_i32, %c0_i32_0 : i32, i32
  }
  func.func @transform_4(%arg0: i32) -> (i32, i32) {
    %c0_i32 = arith.constant 0 : i32
    %c0_i32_0 = arith.constant 0 : i32
    %c0_i32_1 = arith.constant 0 : i32
    return %c0_i32, %c0_i32_0 : i32, i32
  }
  func.func @transform_5(%arg0: i32) -> (i32, i32) {
    %c0_i32 = arith.constant 0 : i32
    %c0_i32_0 = arith.constant 0 : i32
    %c0_i32_1 = arith.constant 0 : i32
    return %c0_i32, %c0_i32_0 : i32, i32
  }
  func.func @transform_6(%arg0: i32) -> (i32, i32) {
    %c0_i32 = arith.constant 0 : i32
    %c0_i32_0 = arith.constant 0 : i32
    %c0_i32_1 = arith.constant 0 : i32
    return %c0_i32, %c0_i32_0 : i32, i32
  }
  func.func @transform_7(%arg0: i32) -> (i32, i32) {
    %c0_i32 = arith.constant 0 : i32
    %c0_i32_0 = arith.constant 0 : i32
    return %arg0, %c0_i32 : i32, i32
  }
}

</mosaic_0001>

<bundles_post_ra>
// kernel: tpu_custom_call.1
= control target key start
LH: loop header
LB: loop body
LE: loop exit
PB: predicated region body
PF: predicated region fallthrough
CT: control target
= control target key end

     0   :  { %vm69_vm0 = vcmask 261120   ;;  %vm951_vm1 = vcmask 130048   ;;  %s1989_s1 = inlined_call_operand.vmem [shape: f32[32,128], index: 1, kind: input, shape index: {}]   ;;  %s1990_s0 = inlined_call_operand.vmem [shape: f32[256,32], index: 0, kind: input, shape index: {}]   ;;  %s1991_s3 = inlined_call_operand.vmem [shape: f32[128,128], index: 3, kind: input, shape index: {}]   ;;  %s1992_s5 = inlined_call_operand.vmem [shape: f32[128,16], index: 5, kind: input, shape index: {}]   ;;  %s1993_s2 = inlined_call_operand.vmem [shape: f32[1,128], index: 2, kind: input, shape index: {}]   ;;  %s1994_s4 = inlined_call_operand.vmem [shape: f32[1,128], index: 4, kind: input, shape index: {}]   ;;  %s1995_s6 = inlined_call_operand.vmem [shape: f32[1,16], index: 6, kind: input, shape index: {}]   ;;  %s1996_s7 = inlined_call_operand.vmem [shape: f32[256,16], index: 7, kind: output, shape index: {}]  }
   0x1   :  { %v59_v0 = vld [vmem:[%s1989_s1] sm:$0xff]  ;;  %v60_v1 = vld [vmem:[%s1989_s1 + $0x8] sm:$0xff]  ;;  %v61_v2 = vld [vmem:[%s1989_s1 + $0x10] sm:$0xff] }
   0x2   :  { %v1371_v3 = vpack.c.bf16 %v60_v1, %v59_v0  ;;  %v62_v4 = vld [vmem:[%s1989_s1 + $0x18] sm:$0xff]  ;;  %v26_v5 = vld [vmem:[%s1990_s0] sm:$0xff]  ;;  %v27_v8 = vld [vmem:[%s1990_s0 + $0x8] sm:$0xff] }
   0x3   :  { %v1375_v6 = vpack.c.bf16 %v62_v4, %v61_v2  ;;  %1163 = vmatprep.mubr.msk.f32.mxu0 %vm69_vm0, %v26_v5  ;;  %v42_v7 = vld [vmem:[%s1990_s0 + $0x80] sm:$0xff]  ;;  %v43_v9 = vld [vmem:[%s1990_s0 + $0x88] sm:$0xff]  ;;  %v28_v10 = vld [vmem:[%s1990_s0 + $0x10] sm:$0xff] }
   0x4   :  { %1372 = vmatprep.subr.bf16.mxu0 %v1371_v3  ;;  %1443 = vmatprep.subr.bf16.mxu1 %v1371_v3  ;;  %v44_v11 = vld [vmem:[%s1990_s0 + $0x90] sm:$0xff]  ;;  %v29_v12 = vld [vmem:[%s1990_s0 + $0x18] sm:$0xff]  ;;  %v424_v14 = vld [vmem:[%s1991_s3] sm:$0xff] }
   0x5   :  { %1374 = vmatpush3.bf16.msra.mxu0 %v1371_v3  ;;  %1445 = vmatpush3.bf16.msra.mxu1 %v1371_v3  ;;  %v45_v13 = vld [vmem:[%s1990_s0 + $0x98] sm:$0xff]  ;;  %v425_v15 = vld [vmem:[%s1991_s3 + $0x8] sm:$0xff]  ;;  %v30_v16 = vld [vmem:[%s1990_s0 + $0x20] sm:$0xff] }
   0x6   :  { %1376 = vmatprep.subr.bf16.mxu0 %v1375_v6  ;;  %1444 = vmatprep.subr.bf16.mxu1 %v1375_v6  ;;  %v46_v17 = vld [vmem:[%s1990_s0 + $0xa0] sm:$0xff]  ;;  %v1379_v18 = vpack.c.bf16 %v425_v15, %v424_v14  ;;  %v426_v19 = vld [vmem:[%s1991_s3 + $0x10] sm:$0xff]  ;;  %v427_v20 = vld [vmem:[%s1991_s3 + $0x18] sm:$0xff] }
   0x7   :  { %1187 = vmatprep.mubr.msk.f32.mxu1 %vm69_vm0, %v42_v7  ;;  %v31_v21 = vld [vmem:[%s1990_s0 + $0x28] sm:$0xff]  ;;  %v32_v23 = vld [vmem:[%s1990_s0 + $0x30] sm:$0xff]  ;;  %v1383_v25 = vpack.c.bf16 %v427_v20, %v426_v19  ;;  %v428_v26 = vld [vmem:[%s1991_s3 + $0x20] sm:$0xff] }
   0x8   :  { %v47_v22 = vld [vmem:[%s1990_s0 + $0xa8] sm:$0xff]  ;;  %v48_v24 = vld [vmem:[%s1990_s0 + $0xb0] sm:$0xff]  ;;  %v33_v28 = vld [vmem:[%s1990_s0 + $0x38] sm:$0xff] }
   0x9   :  { %1378 = vmatpush3.bf16.msra.mxu0 %v1375_v6  ;;  %1446 = vmatpush3.bf16.msra.mxu1 %v1375_v6  ;;  %v429_v27 = vld [vmem:[%s1991_s3 + $0x28] sm:$0xff]  ;;  %v49_v29 = vld [vmem:[%s1990_s0 + $0xb8] sm:$0xff]  ;;  %v34_v30 = vld [vmem:[%s1990_s0 + $0x40] sm:$0xff] }
   0xa   :  { %1380 = vmatprep.subr.bf16.mxu1 %v1379_v18  ;;  %v50_v31 = vld [vmem:[%s1990_s0 + $0xc0] sm:$0xff]  ;;  %v1387_v32 = vpack.c.bf16 %v429_v27, %v428_v26  ;;  %v430_v33 = vld [vmem:[%s1991_s3 + $0x30] sm:$0xff]  ;;  %v431_v34 = vld [vmem:[%s1991_s3 + $0x38] sm:$0xff] }
   0xb   :  { %v35_v35 = vld [vmem:[%s1990_s0 + $0x48] sm:$0xff]  ;;  %v36_v37 = vld [vmem:[%s1990_s0 + $0x50] sm:$0xff]  ;;  %v1391_v39 = vpack.c.bf16 %v431_v34, %v430_v33  ;;  %v432_v40 = vld [vmem:[%s1991_s3 + $0x40] sm:$0xff] }
   0xc   :  { %1164 = vmatmul.mubr.msk.f32.vlgmr.msra.gmra.mrb[0].mxu0 %vm69_vm0, %v27_v8  ;;  %1188 = vmatmul.mubr.msk.f32.vlgmr.msra.gmra.mrb[0].mxu1 %vm69_vm0, %v43_v9  ;;  %v51_v36 = vld [vmem:[%s1990_s0 + $0xc8] sm:$0xff]  ;;  %v52_v38 = vld [vmem:[%s1990_s0 + $0xd0] sm:$0xff]  ;;  %v37_v42 = vld [vmem:[%s1990_s0 + $0x58] sm:$0xff] }
   0xd   :  { %1166 = vmatprep.mubr.msk.f32.mxu0 %vm69_vm0, %v28_v10  ;;  %1190 = vmatprep.mubr.msk.f32.mxu1 %vm69_vm0, %v44_v11  ;;  %v433_v41 = vld [vmem:[%s1991_s3 + $0x48] sm:$0xff]  ;;  %v53_v43 = vld [vmem:[%s1990_s0 + $0xd8] sm:$0xff]  ;;  %v38_v44 = vld [vmem:[%s1990_s0 + $0x60] sm:$0xff] }
   0xe   :  { %1382 = vmatpush3.bf16.msra.mxu1 %v1379_v18  ;;  %v54_v45 = vld [vmem:[%s1990_s0 + $0xe0] sm:$0xff]  ;;  %v1395_v46 = vpack.c.bf16 %v433_v41, %v432_v40  ;;  %v434_v47 = vld [vmem:[%s1991_s3 + $0x50] sm:$0xff]  ;;  %v435_v48 = vld [vmem:[%s1991_s3 + $0x58] sm:$0xff] }
   0xf   :  { %1384 = vmatprep.subr.bf16.mxu1 %v1383_v25  ;;  %v39_v49 = vld [vmem:[%s1990_s0 + $0x68] sm:$0xff]  ;;  %v40_v50 = vld [vmem:[%s1990_s0 + $0x70] sm:$0xff]  ;;  %v1399_v53 = vpack.c.bf16 %v435_v48, %v434_v47  ;;  %v436_v54 = vld [vmem:[%s1991_s3 + $0x60] sm:$0xff] }
  0x10   :  { %1167 = vmatmul.mubr.msk.f32.gmra.mrb[2].mxu0 %vm69_vm0, %v29_v12  ;;  %1191 = vmatmul.mubr.msk.f32.gmra.mrb[2].mxu1 %vm69_vm0, %v45_v13  ;;  %v55_v51 = vld [vmem:[%s1990_s0 + $0xe8] sm:$0xff]  ;;  %v56_v52 = vld [vmem:[%s1990_s0 + $0xf0] sm:$0xff]  ;;  %v41_v56 = vld [vmem:[%s1990_s0 + $0x78] sm:$0xff] }
  0x11   :  { %1169 = vmatprep.mubr.msk.f32.mxu0 %vm69_vm0, %v30_v16  ;;  %1193 = vmatprep.mubr.msk.f32.mxu1 %vm69_vm0, %v46_v17  ;;  %v437_v55 = vld [vmem:[%s1991_s3 + $0x68] sm:$0xff]  ;;  %v57_v57 = vld [vmem:[%s1990_s0 + $0xf8] sm:$0xff]  ;;  %v438_v59 = vld [vmem:[%s1991_s3 + $0x70] sm:$0xff] }
  0x12   :  { %1386 = vmatpush3.bf16.msra.mxu1 %v1383_v25  ;;  %v1403_v58 = vpack.c.bf16 %v437_v55, %v436_v54  ;;  %v439_v60 = vld [vmem:[%s1991_s3 + $0x78] sm:$0xff]  ;;  %v704_v62 = vld [vmem:[%s1992_s5] sm:$0xff]  ;;  %v705_v63 = vld [vmem:[%s1992_s5 + $0x8] sm:$0xff] }
  0x13   :  { %1388 = vmatprep.subr.bf16.mxu1 %v1387_v32  ;;  %v1407_v61 = vpack.c.bf16 %v439_v60, %v438_v59  ;;  %v706_v0 = vld [vmem:[%s1992_s5 + $0x10] sm:$0xff]  ;;  %v1411_v1 = vpack.c.bf16 %v705_v63, %v704_v62  ;;  %v707_v2 = vld [vmem:[%s1992_s5 + $0x18] sm:$0xff]  ;;  %v708_v4 = vld [vmem:[%s1992_s5 + $0x20] sm:$0xff] }
  0x14   :  { %1170 = vmatmul.mubr.msk.f32.gmra.mrb[4].mxu0 %vm69_vm0, %v31_v21  ;;  %1194 = vmatmul.mubr.msk.f32.gmra.mrb[4].mxu1 %vm69_vm0, %v47_v22  ;;  %v1415_v3 = vpack.c.bf16 %v707_v2, %v706_v0  ;;  %v709_v5 = vld [vmem:[%s1992_s5 + $0x28] sm:$0xff]  ;;  %v710_v7 = vld [vmem:[%s1992_s5 + $0x30] sm:$0xff]  ;;  %v711_v8 = vld [vmem:[%s1992_s5 + $0x38] sm:$0xff] }
  0x15   :  { %1172 = vmatprep.mubr.msk.f32.mxu0 %vm69_vm0, %v32_v23  ;;  %1196 = vmatprep.mubr.msk.f32.mxu1 %vm69_vm0, %v48_v24  ;;  %v1419_v6 = vpack.c.bf16 %v709_v5, %v708_v4  ;;  %v1423_v9 = vpack.c.bf16 %v711_v8, %v710_v7  ;;  %v712_v10 = vld [vmem:[%s1992_s5 + $0x40] sm:$0xff]  ;;  %v713_v11 = vld [vmem:[%s1992_s5 + $0x48] sm:$0xff]  ;;  %v714_v13 = vld [vmem:[%s1992_s5 + $0x50] sm:$0xff] }
  0x16   :  { %1390 = vmatpush3.bf16.msra.mxu1 %v1387_v32  ;;  %1412 = vmatprep.subr.bf16.mxu0 %v1411_v1  ;;  %v1427_v12 = vpack.c.bf16 %v713_v11, %v712_v10  ;;  %v715_v14 = vld [vmem:[%s1992_s5 + $0x58] sm:$0xff]  ;;  %v716_v16 = vld [vmem:[%s1992_s5 + $0x60] sm:$0xff]  ;;  %v717_v17 = vld [vmem:[%s1992_s5 + $0x68] sm:$0xff] }
  0x17   :  { %1392 = vmatprep.subr.bf16.mxu1 %v1391_v39  ;;  %1414 = vmatpush3.bf16.msra.mxu0 %v1411_v1  ;;  %v1431_v15 = vpack.c.bf16 %v715_v14, %v714_v13  ;;  %v1435_v18 = vpack.c.bf16 %v717_v17, %v716_v16  ;;  %v1720_v19 = vld [vmem:[%s1993_s2] ss:$0 sm:$0xff] }
  0x18   :  { %1173 = vmatmul.mubr.msk.f32.gmra.mrb[6].mxu0 %vm69_vm0, %v33_v28  ;;  %1197 = vmatmul.mubr.msk.f32.gmra.mrb[6].mxu1 %vm69_vm0, %v49_v29 }
  0x19   :  { %1175 = vmatprep.mubr.msk.f32.mxu0 %vm69_vm0, %v34_v30  ;;  %1199 = vmatprep.mubr.msk.f32.mxu1 %vm69_vm0, %v50_v31 }
  0x1a   :  { %1394 = vmatpush3.bf16.msra.mxu1 %v1391_v39  ;;  %1416 = vmatprep.subr.bf16.mxu0 %v1415_v3 }
  0x1b   :  { %1396 = vmatprep.subr.bf16.mxu1 %v1395_v46  ;;  %1418 = vmatpush3.bf16.msra.mxu0 %v1415_v3 }
  0x1c   :  { %1176 = vmatmul.mubr.msk.f32.gmra.mrb[8].mxu0 %vm69_vm0, %v35_v35  ;;  %1200 = vmatmul.mubr.msk.f32.gmra.mrb[8].mxu1 %vm69_vm0, %v51_v36 }
  0x1d   :  { %1178 = vmatprep.mubr.msk.f32.mxu0 %vm69_vm0, %v36_v37  ;;  %1202 = vmatprep.mubr.msk.f32.mxu1 %vm69_vm0, %v52_v38 }
  0x1e   :  { %1398 = vmatpush3.bf16.msra.mxu1 %v1395_v46  ;;  %1420 = vmatprep.subr.bf16.mxu0 %v1419_v6 }
  0x1f   :  { %1400 = vmatprep.subr.bf16.mxu1 %v1399_v53  ;;  %1422 = vmatpush3.bf16.msra.mxu0 %v1419_v6 }
  0x20   :  { %1179 = vmatmul.mubr.msk.f32.gmra.mrb[10].mxu0 %vm69_vm0, %v37_v42  ;;  %1203 = vmatmul.mubr.msk.f32.gmra.mrb[10].mxu1 %vm69_vm0, %v53_v43 }
  0x21   :  { %1181 = vmatprep.mubr.msk.f32.mxu0 %vm69_vm0, %v38_v44  ;;  %1205 = vmatprep.mubr.msk.f32.mxu1 %vm69_vm0, %v54_v45 }
  0x22   :  { %1402 = vmatpush3.bf16.msra.mxu1 %v1399_v53  ;;  %1424 = vmatprep.subr.bf16.mxu0 %v1423_v9 }
  0x23   :  { %1404 = vmatprep.subr.bf16.mxu1 %v1403_v58  ;;  %1426 = vmatpush3.bf16.msra.mxu0 %v1423_v9 }
  0x24   :  { %1182 = vmatmul.mubr.msk.f32.gmra.mrb[12].mxu0 %vm69_vm0, %v39_v49  ;;  %1206 = vmatmul.mubr.msk.f32.gmra.mrb[12].mxu1 %vm69_vm0, %v55_v51 }
  0x25   :  { %1184 = vmatprep.mubr.msk.f32.mxu0 %vm69_vm0, %v40_v50  ;;  %1208 = vmatprep.mubr.msk.f32.mxu1 %vm69_vm0, %v56_v52 }
  0x26   :  { %1406 = vmatpush3.bf16.msra.mxu1 %v1403_v58  ;;  %1428 = vmatprep.subr.bf16.mxu0 %v1427_v12 }
  0x27   :  { %1408 = vmatprep.subr.bf16.mxu1 %v1407_v61  ;;  %1430 = vmatpush3.bf16.msra.mxu0 %v1427_v12 }
  0x28   :  { %1185 = vmatmul.mubr.msk.f32.gmra.mrb[14].mxu0 %vm69_vm0, %v41_v56  ;;  %1209 = vmatmul.mubr.msk.f32.gmra.mrb[14].mxu1 %vm69_vm0, %v57_v57 }
  0x29   :  { %1432 = vmatprep.subr.bf16.mxu0 %v1431_v15 }
  0x2a   :  { %1410 = vmatpush3.bf16.msra.mxu1 %v1407_v61 }
  0x2b   :  { %1434 = vmatpush3.bf16.msra.mxu0 %v1431_v15 }
  0x2c   :  { %1436 = vmatprep.subr.bf16.mxu0 %v1435_v18 }
  0x2f   :  { %1438 = vmatpush3.bf16.msra.mxu0 %v1435_v18 }
  0xdf   :  { %v1165_v20 = vpop.f32.mrb[0].mxu0  ;;  %v1722_v21 = vpop.f32.mrb[0].mxu1 }
  0xe0   :  { %v238_v22 = vadd.f32 %v1165_v20, %v1720_v19  ;;  %v232_v23 = vpop.f32.mrb[1].mxu0  ;;  %v1725_v24 = vpop.f32.mrb[1].mxu1 }
  0xe1   :  { %v233_v25 = vadd.f32 %v1720_v19, %v232_v23  ;;  %v313_v12 = vadd.f32 %v1720_v19, %v1725_v24 }
  0xe2   :  { %v392_v29 = vmax.f32 %v238_v22, 0.0 }
  0xe3   :  { %v391_v26 = vmax.f32 %v233_v25, 0.0  ;;  %v1168_v27 = vpop.f32.mrb[2].mxu0  ;;  %v1728_v28 = vpop.f32.mrb[2].mxu1  ;;  %v407_v22 = vmax.f32 %v313_v12, 0.0 }
  0xe4   :  { %v248_v30 = vadd.f32 %v1168_v27, %v1720_v19  ;;  %v242_v31 = vpop.f32.mrb[3].mxu0  ;;  %v1731_v32 = vpop.f32.mrb[3].mxu1 }
  0xe5   :  { %v243_v33 = vadd.f32 %v1720_v19, %v242_v31  ;;  %1243 = vmatprep.mubr.f32.mxu1 %v391_v26  ;;  %v323_v23 = vadd.f32 %v1720_v19, %v1731_v32  ;;  %v318_v26 = vadd.f32 %v1722_v21, %v1720_v19 }
  0xe6   :  { %1244 = vmatmul.mubr.f32.vlgmr.msra.gmra.mrb[16].mxu1 %v392_v29  ;;  %v394_v37 = vmax.f32 %v248_v30, 0.0  ;;  %v328_v30 = vadd.f32 %v1728_v28, %v1720_v19 }
  0xe7   :  { %v393_v34 = vmax.f32 %v243_v33, 0.0  ;;  %v1171_v35 = vpop.f32.mrb[4].mxu0  ;;  %v1734_v36 = vpop.f32.mrb[4].mxu1  ;;  %v409_v24 = vmax.f32 %v323_v23, 0.0  ;;  %v408_v29 = vmax.f32 %v318_v26, 0.0 }
  0xe8   :  { %v258_v38 = vadd.f32 %v1171_v35, %v1720_v19  ;;  %v252_v39 = vpop.f32.mrb[5].mxu0  ;;  %v1737_v40 = vpop.f32.mrb[5].mxu1  ;;  %v410_v33 = vmax.f32 %v328_v30, 0.0  ;;  %v338_v21 = vadd.f32 %v1734_v36, %v1720_v19 }
  0xe9   :  { %v253_v41 = vadd.f32 %v1720_v19, %v252_v39  ;;  %1246 = vmatprep.mubr.f32.mxu1 %v393_v34  ;;  %v333_v27 = vadd.f32 %v1720_v19, %v1737_v40 }
  0xea   :  { %1247 = vmatmul.mubr.f32.gmra.mrb[18].mxu1 %v394_v37  ;;  %v396_v45 = vmax.f32 %v258_v38, 0.0  ;;  %v412_v37 = vmax.f32 %v338_v21, 0.0 }
  0xeb   :  { %v395_v42 = vmax.f32 %v253_v41, 0.0  ;;  %v1174_v43 = vpop.f32.mrb[6].mxu0  ;;  %v1740_v44 = vpop.f32.mrb[6].mxu1  ;;  %v411_v31 = vmax.f32 %v333_v27, 0.0 }
  0xec   :  { %v268_v46 = vadd.f32 %v1174_v43, %v1720_v19  ;;  %v262_v47 = vpop.f32.mrb[7].mxu0  ;;  %v342_v48 = vpop.f32.mrb[7].mxu1  ;;  %v348_v38 = vadd.f32 %v1740_v44, %v1720_v19 }
  0xed   :  { %v263_v49 = vadd.f32 %v1720_v19, %v262_v47  ;;  %1249 = vmatprep.mubr.f32.mxu1 %v395_v42  ;;  %v343_v32 = vadd.f32 %v1720_v19, %v342_v48 }
  0xee   :  { %1250 = vmatmul.mubr.f32.gmra.mrb[20].mxu1 %v396_v45  ;;  %v398_v53 = vmax.f32 %v268_v46, 0.0  ;;  %v414_v40 = vmax.f32 %v348_v38, 0.0 }
  0xef   :  { %v397_v50 = vmax.f32 %v263_v49, 0.0  ;;  %v1177_v51 = vpop.f32.mrb[8].mxu0  ;;  %v1744_v52 = vpop.f32.mrb[8].mxu1  ;;  %v413_v34 = vmax.f32 %v343_v32, 0.0 }
  0xf0   :  { %v278_v54 = vadd.f32 %v1177_v51, %v1720_v19  ;;  %v272_v55 = vpop.f32.mrb[9].mxu0  ;;  %v352_v56 = vpop.f32.mrb[9].mxu1  ;;  %v358_v41 = vadd.f32 %v1744_v52, %v1720_v19 }
  0xf1   :  { %v273_v57 = vadd.f32 %v1720_v19, %v272_v55  ;;  %1252 = vmatprep.mubr.f32.mxu1 %v397_v50  ;;  %v353_v35 = vadd.f32 %v1720_v19, %v352_v56  ;;  %v1790_v56 = vld [vmem:[%s1994_s4] ss:$0 sm:$0xff] }
  0xf2   :  { %1253 = vmatmul.mubr.f32.gmra.mrb[22].mxu1 %v398_v53  ;;  %v400_v61 = vmax.f32 %v278_v54, 0.0  ;;  %v416_v43 = vmax.f32 %v358_v41, 0.0  ;;  %v718_v53 = vld [vmem:[%s1992_s5 + $0x70] sm:$0xff]  ;;  %v719_v54 = vld [vmem:[%s1992_s5 + $0x78] sm:$0xff] }
  0xf3   :  { %v399_v58 = vmax.f32 %v273_v57, 0.0  ;;  %v1180_v59 = vpop.f32.mrb[10].mxu0  ;;  %v1748_v60 = vpop.f32.mrb[10].mxu1  ;;  %v415_v28 = vmax.f32 %v353_v35, 0.0  ;;  %v1439_v55 = vpack.c.bf16 %v719_v54, %v718_v53 }
  0xf4   :  { %v288_v62 = vadd.f32 %v1180_v59, %v1720_v19  ;;  %v282_v63 = vpop.f32.mrb[11].mxu0  ;;  %v362_v0 = vpop.f32.mrb[11].mxu1  ;;  %v368_v45 = vadd.f32 %v1748_v60, %v1720_v19 }
  0xf5   :  { %v283_v1 = vadd.f32 %v1720_v19, %v282_v63  ;;  %1255 = vmatprep.mubr.f32.mxu1 %v399_v58  ;;  %v363_v39 = vadd.f32 %v1720_v19, %v362_v0  ;;  %1440 = vmatprep.subr.bf16.mxu0 %v1439_v55 }
  0xf6   :  { %1256 = vmatmul.mubr.f32.gmra.mrb[24].mxu1 %v400_v61  ;;  %v402_v5 = vmax.f32 %v288_v62, 0.0  ;;  %v418_v47 = vmax.f32 %v368_v45, 0.0  ;;  %1442 = vmatpush3.bf16.msra.mxu0 %v1439_v55 }
  0xf7   :  { %v401_v2 = vmax.f32 %v283_v1, 0.0  ;;  %v1183_v3 = vpop.f32.mrb[12].mxu0  ;;  %v1207_v4 = vpop.f32.mrb[12].mxu1  ;;  %v417_v36 = vmax.f32 %v363_v39, 0.0 }
  0xf8   :  { %v298_v6 = vadd.f32 %v1183_v3, %v1720_v19  ;;  %v292_v7 = vpop.f32.mrb[13].mxu0  ;;  %v372_v8 = vpop.f32.mrb[13].mxu1  ;;  %v378_v48 = vadd.f32 %v1207_v4, %v1720_v19 }
  0xf9   :  { %v293_v9 = vadd.f32 %v1720_v19, %v292_v7  ;;  %1258 = vmatprep.mubr.f32.mxu1 %v401_v2  ;;  %v373_v42 = vadd.f32 %v1720_v19, %v372_v8 }
  0xfa   :  { %1259 = vmatmul.mubr.f32.gmra.mrb[26].mxu1 %v402_v5  ;;  %v404_v14 = vmax.f32 %v298_v6, 0.0  ;;  %v420_v50 = vmax.f32 %v378_v48, 0.0 }
  0xfb   :  { %v403_v10 = vmax.f32 %v293_v9, 0.0  ;;  %v1186_v11 = vpop.f32.mrb[14].mxu0  ;;  %v1210_v13 = vpop.f32.mrb[14].mxu1  ;;  %v419_v44 = vmax.f32 %v373_v42, 0.0 }
  0xfc   :  { %v308_v15 = vadd.f32 %v1186_v11, %v1720_v19  ;;  %v302_v16 = vpop.f32.mrb[15].mxu0  ;;  %v382_v17 = vpop.f32.mrb[15].mxu1  ;;  %v388_v51 = vadd.f32 %v1210_v13, %v1720_v19 }
  0xfd   :  { %v303_v18 = vadd.f32 %v1720_v19, %v302_v16  ;;  %1261 = vmatprep.mubr.f32.mxu1 %v403_v10  ;;  %v383_v46 = vadd.f32 %v1720_v19, %v382_v17 }
  0xfe   :  { %1262 = vmatmul.mubr.f32.gmra.mrb[28].mxu1 %v404_v14  ;;  %v406_v25 = vmax.f32 %v308_v15, 0.0  ;;  %v422_v52 = vmax.f32 %v388_v51, 0.0 }
  0xff   :  { %v405_v20 = vmax.f32 %v303_v18, 0.0  ;;  %v421_v49 = vmax.f32 %v383_v46, 0.0 }
 0x101   :  { %1264 = vmatprep.mubr.f32.mxu1 %v405_v20 }
 0x102   :  { %1265 = vmatmul.mubr.f32.gmra.mrb[30].mxu1 %v406_v25 }
 0x103   :  { %1267 = vmatprep.mubr.f32.mxu1 %v407_v22 }
 0x106   :  { %1268 = vmatmul.mubr.f32.gmra.mrb[32].mxu1 %v408_v29 }
 0x107   :  { %1270 = vmatprep.mubr.f32.mxu1 %v409_v24 }
 0x10a   :  { %1271 = vmatmul.mubr.f32.gmra.mrb[34].mxu1 %v410_v33 }
 0x10b   :  { %1273 = vmatprep.mubr.f32.mxu1 %v411_v31 }
 0x10e   :  { %1274 = vmatmul.mubr.f32.gmra.mrb[36].mxu1 %v412_v37 }
 0x10f   :  { %1276 = vmatprep.mubr.f32.mxu1 %v413_v34 }
 0x112   :  { %1277 = vmatmul.mubr.f32.gmra.mrb[38].mxu1 %v414_v40 }
 0x113   :  { %1279 = vmatprep.mubr.f32.mxu1 %v415_v28 }
 0x116   :  { %1280 = vmatmul.mubr.f32.gmra.mrb[40].mxu1 %v416_v43 }
 0x117   :  { %1282 = vmatprep.mubr.f32.mxu1 %v417_v36 }
 0x11a   :  { %1283 = vmatmul.mubr.f32.gmra.mrb[42].mxu1 %v418_v47 }
 0x11b   :  { %1285 = vmatprep.mubr.f32.mxu1 %v419_v44 }
 0x11e   :  { %1286 = vmatmul.mubr.f32.gmra.mrb[44].mxu1 %v420_v50 }
 0x11f   :  { %1288 = vmatprep.mubr.f32.mxu1 %v421_v49 }
 0x122   :  { %1289 = vmatmul.mubr.f32.gmra.mrb[46].mxu1 %v422_v52 }
 0x1b9   :  { %v1245_v19 = vpop.f32.mrb[16].mxu1 }
 0x1ba   :  { %v518_v57 = vadd.f32 %v1245_v19, %v1790_v56  ;;  %v512_v58 = vpop.f32.mrb[17].mxu1 }
 0x1bb   :  { %v513_v59 = vadd.f32 %v1790_v56, %v512_v58 }
 0x1bc   :  { %v672_v62 = vmax.f32 %v518_v57, 0.0 }
 0x1bd   :  { %v671_v60 = vmax.f32 %v513_v59, 0.0  ;;  %v1248_v61 = vpop.f32.mrb[18].mxu1 }
 0x1be   :  { %v528_v63 = vadd.f32 %v1248_v61, %v1790_v56  ;;  %v522_v0 = vpop.f32.mrb[19].mxu1 }
 0x1bf   :  { %v523_v1 = vadd.f32 %v1790_v56, %v522_v0  ;;  %1323 = vmatprep.mubr.f32.mxu0 %v671_v60 }
 0x1c0   :  { %1324 = vmatmul.mubr.f32.vlgmr.msra.gmra.mrb[16].mxu0 %v672_v62  ;;  %v674_v4 = vmax.f32 %v528_v63, 0.0 }
 0x1c1   :  { %v673_v2 = vmax.f32 %v523_v1, 0.0  ;;  %v1251_v3 = vpop.f32.mrb[20].mxu1 }
 0x1c2   :  { %v538_v5 = vadd.f32 %v1251_v3, %v1790_v56  ;;  %v532_v6 = vpop.f32.mrb[21].mxu1 }
 0x1c3   :  { %v533_v7 = vadd.f32 %v1790_v56, %v532_v6  ;;  %1326 = vmatprep.mubr.f32.mxu0 %v673_v2 }
 0x1c4   :  { %1327 = vmatmul.mubr.f32.gmra.mrb[18].mxu0 %v674_v4  ;;  %v676_v10 = vmax.f32 %v538_v5, 0.0 }
 0x1c5   :  { %v675_v8 = vmax.f32 %v533_v7, 0.0  ;;  %v1254_v9 = vpop.f32.mrb[22].mxu1 }
 0x1c6   :  { %v548_v11 = vadd.f32 %v1254_v9, %v1790_v56  ;;  %v542_v12 = vpop.f32.mrb[23].mxu1 }
 0x1c7   :  { %v543_v13 = vadd.f32 %v1790_v56, %v542_v12  ;;  %1329 = vmatprep.mubr.f32.mxu0 %v675_v8 }
 0x1c8   :  { %1330 = vmatmul.mubr.f32.gmra.mrb[20].mxu0 %v676_v10  ;;  %v678_v16 = vmax.f32 %v548_v11, 0.0 }
 0x1c9   :  { %v677_v14 = vmax.f32 %v543_v13, 0.0  ;;  %v1257_v15 = vpop.f32.mrb[24].mxu1 }
 0x1ca   :  { %v558_v17 = vadd.f32 %v1257_v15, %v1790_v56  ;;  %v552_v18 = vpop.f32.mrb[25].mxu1 }
 0x1cb   :  { %v553_v20 = vadd.f32 %v1790_v56, %v552_v18  ;;  %1332 = vmatprep.mubr.f32.mxu0 %v677_v14 }
 0x1cc   :  { %1333 = vmatmul.mubr.f32.gmra.mrb[22].mxu0 %v678_v16  ;;  %v680_v25 = vmax.f32 %v558_v17, 0.0 }
 0x1cd   :  { %v679_v22 = vmax.f32 %v553_v20, 0.0  ;;  %v1260_v23 = vpop.f32.mrb[26].mxu1 }
 0x1ce   :  { %v568_v26 = vadd.f32 %v1260_v23, %v1790_v56  ;;  %v562_v24 = vpop.f32.mrb[27].mxu1 }
 0x1cf   :  { %v563_v27 = vadd.f32 %v1790_v56, %v562_v24  ;;  %1335 = vmatprep.mubr.f32.mxu0 %v679_v22 }
 0x1d0   :  { %1336 = vmatmul.mubr.f32.gmra.mrb[24].mxu0 %v680_v25  ;;  %v682_v31 = vmax.f32 %v568_v26, 0.0 }
 0x1d1   :  { %v681_v29 = vmax.f32 %v563_v27, 0.0  ;;  %v1263_v30 = vpop.f32.mrb[28].mxu1  ;;  %v1827_v27 = vld [vmem:[%s1995_s6] ss:$0 sm:$0xff] }
 0x1d2   :  { %v578_v32 = vadd.f32 %v1263_v30, %v1790_v56  ;;  %v572_v33 = vpop.f32.mrb[29].mxu1 }
 0x1d3   :  { %v573_v21 = vadd.f32 %v1790_v56, %v572_v33  ;;  %1338 = vmatprep.mubr.f32.mxu0 %v681_v29 }
 0x1d4   :  { %1339 = vmatmul.mubr.f32.gmra.mrb[26].mxu0 %v682_v31  ;;  %v684_v37 = vmax.f32 %v578_v32, 0.0 }
 0x1d5   :  { %v683_v34 = vmax.f32 %v573_v21, 0.0  ;;  %v1266_v35 = vpop.f32.mrb[30].mxu1 }
 0x1d6   :  { %v588_v38 = vadd.f32 %v1266_v35, %v1790_v56  ;;  %v582_v28 = vpop.f32.mrb[31].mxu1 }
 0x1d7   :  { %v583_v39 = vadd.f32 %v1790_v56, %v582_v28  ;;  %1341 = vmatprep.mubr.f32.mxu0 %v683_v34 }
 0x1d8   :  { %1342 = vmatmul.mubr.f32.gmra.mrb[28].mxu0 %v684_v37  ;;  %v686_v36 = vmax.f32 %v588_v38, 0.0 }
 0x1d9   :  { %v685_v40 = vmax.f32 %v583_v39, 0.0  ;;  %v1269_v41 = vpop.f32.mrb[32].mxu1 }
 0x1da   :  { %v598_v42 = vadd.f32 %v1269_v41, %v1790_v56  ;;  %v592_v43 = vpop.f32.mrb[33].mxu1 }
 0x1db   :  { %v593_v45 = vadd.f32 %v1790_v56, %v592_v43  ;;  %1344 = vmatprep.mubr.f32.mxu0 %v685_v40 }
 0x1dc   :  { %1345 = vmatmul.mubr.f32.gmra.mrb[30].mxu0 %v686_v36  ;;  %v688_v47 = vmax.f32 %v598_v42, 0.0 }
 0x1dd   :  { %v687_v44 = vmax.f32 %v593_v45, 0.0  ;;  %v1272_v46 = vpop.f32.mrb[34].mxu1 }
 0x1de   :  { %v608_v48 = vadd.f32 %v1272_v46, %v1790_v56  ;;  %v602_v49 = vpop.f32.mrb[35].mxu1 }
 0x1df   :  { %v603_v50 = vadd.f32 %v1790_v56, %v602_v49  ;;  %1347 = vmatprep.mubr.f32.mxu0 %v687_v44 }
 0x1e0   :  { %1348 = vmatmul.mubr.f32.gmra.mrb[32].mxu0 %v688_v47  ;;  %v690_v53 = vmax.f32 %v608_v48, 0.0 }
 0x1e1   :  { %v689_v51 = vmax.f32 %v603_v50, 0.0  ;;  %v1275_v52 = vpop.f32.mrb[36].mxu1 }
 0x1e2   :  { %v618_v54 = vadd.f32 %v1275_v52, %v1790_v56  ;;  %v612_v55 = vpop.f32.mrb[37].mxu1 }
 0x1e3   :  { %v613_v19 = vadd.f32 %v1790_v56, %v612_v55  ;;  %1350 = vmatprep.mubr.f32.mxu0 %v689_v51 }
 0x1e4   :  { %1351 = vmatmul.mubr.f32.gmra.mrb[34].mxu0 %v690_v53  ;;  %v692_v59 = vmax.f32 %v618_v54, 0.0 }
 0x1e5   :  { %v691_v57 = vmax.f32 %v613_v19, 0.0  ;;  %v1278_v58 = vpop.f32.mrb[38].mxu1 }
 0x1e6   :  { %v628_v60 = vadd.f32 %v1278_v58, %v1790_v56  ;;  %v622_v61 = vpop.f32.mrb[39].mxu1 }
 0x1e7   :  { %v623_v62 = vadd.f32 %v1790_v56, %v622_v61  ;;  %1353 = vmatprep.mubr.f32.mxu0 %v691_v57 }
 0x1e8   :  { %1354 = vmatmul.mubr.f32.gmra.mrb[36].mxu0 %v692_v59  ;;  %v694_v1 = vmax.f32 %v628_v60, 0.0 }
 0x1e9   :  { %v693_v63 = vmax.f32 %v623_v62, 0.0  ;;  %v1281_v0 = vpop.f32.mrb[40].mxu1 }
 0x1ea   :  { %v638_v2 = vadd.f32 %v1281_v0, %v1790_v56  ;;  %v632_v3 = vpop.f32.mrb[41].mxu1 }
 0x1eb   :  { %v633_v4 = vadd.f32 %v1790_v56, %v632_v3  ;;  %1356 = vmatprep.mubr.f32.mxu0 %v693_v63 }
 0x1ec   :  { %1357 = vmatmul.mubr.f32.gmra.mrb[38].mxu0 %v694_v1  ;;  %v696_v7 = vmax.f32 %v638_v2, 0.0 }
 0x1ed   :  { %v695_v5 = vmax.f32 %v633_v4, 0.0  ;;  %v1284_v6 = vpop.f32.mrb[42].mxu1 }
 0x1ee   :  { %v648_v8 = vadd.f32 %v1284_v6, %v1790_v56  ;;  %v642_v9 = vpop.f32.mrb[43].mxu1 }
 0x1ef   :  { %v643_v10 = vadd.f32 %v1790_v56, %v642_v9  ;;  %1359 = vmatprep.mubr.f32.mxu0 %v695_v5 }
 0x1f0   :  { %1360 = vmatmul.mubr.f32.gmra.mrb[40].mxu0 %v696_v7  ;;  %v698_v13 = vmax.f32 %v648_v8, 0.0 }
 0x1f1   :  { %v697_v11 = vmax.f32 %v643_v10, 0.0  ;;  %v1287_v12 = vpop.f32.mrb[44].mxu1 }
 0x1f2   :  { %v658_v14 = vadd.f32 %v1287_v12, %v1790_v56  ;;  %v652_v15 = vpop.f32.mrb[45].mxu1 }
 0x1f3   :  { %v653_v16 = vadd.f32 %v1790_v56, %v652_v15  ;;  %1362 = vmatprep.mubr.f32.mxu0 %v697_v11 }
 0x1f4   :  { %1363 = vmatmul.mubr.f32.gmra.mrb[42].mxu0 %v698_v13  ;;  %v700_v20 = vmax.f32 %v658_v14, 0.0 }
 0x1f5   :  { %v699_v17 = vmax.f32 %v653_v16, 0.0  ;;  %v1290_v18 = vpop.f32.mrb[46].mxu1 }
 0x1f6   :  { %v668_v22 = vadd.f32 %v1290_v18, %v1790_v56  ;;  %v662_v23 = vpop.f32.mrb[47].mxu1 }
 0x1f7   :  { %v663_v25 = vadd.f32 %v1790_v56, %v662_v23  ;;  %1365 = vmatprep.mubr.f32.mxu0 %v699_v17 }
 0x1f8   :  { %1366 = vmatmul.mubr.f32.gmra.mrb[44].mxu0 %v700_v20  ;;  %v702_v24 = vmax.f32 %v668_v22, 0.0 }
 0x1f9   :  { %v701_v26 = vmax.f32 %v663_v25, 0.0 }
 0x1fb   :  { %1368 = vmatprep.mubr.f32.mxu0 %v701_v26 }
 0x1fc   :  { %1369 = vmatmul.mubr.f32.gmra.mrb[46].mxu0 %v702_v24 }
 0x293   :  { %v1325_v29 = vpop.f32.mrb[16].mxu0 }
 0x294   :  { %v798_v30 = vadd.f32 %v1325_v29, %v1827_v27  ;;  %v792_v31 = vpop.f32.mrb[17].mxu0 }
 0x295   :  { %v793_v32 = vadd.f32 %v1827_v27, %v792_v31 }
 0x296   :  { %953 = vst.msk [vmem:[%s1996_s7 + $0x8] sm:$0xff] %vm951_vm1, %v798_v30 }
 0x297   :  { %952 = vst.msk [vmem:[%s1996_s7] sm:$0xff] %vm951_vm1, %v793_v32  ;;  %v1328_v56 = vpop.f32.mrb[18].mxu0 }
 0x298   :  { %v808_v33 = vadd.f32 %v1328_v56, %v1827_v27  ;;  %v802_v21 = vpop.f32.mrb[19].mxu0 }
 0x299   :  { %v803_v34 = vadd.f32 %v1827_v27, %v802_v21 }
 0x29a   :  { %955 = vst.msk [vmem:[%s1996_s7 + $0x18] sm:$0xff] %vm951_vm1, %v808_v33 }
 0x29b   :  { %954 = vst.msk [vmem:[%s1996_s7 + $0x10] sm:$0xff] %vm951_vm1, %v803_v34  ;;  %v1331_v35 = vpop.f32.mrb[20].mxu0 }
 0x29c   :  { %v818_v37 = vadd.f32 %v1331_v35, %v1827_v27  ;;  %v812_v38 = vpop.f32.mrb[21].mxu0 }
 0x29d   :  { %v813_v28 = vadd.f32 %v1827_v27, %v812_v38 }
 0x29e   :  { %957 = vst.msk [vmem:[%s1996_s7 + $0x28] sm:$0xff] %vm951_vm1, %v818_v37 }
 0x29f   :  { %956 = vst.msk [vmem:[%s1996_s7 + $0x20] sm:$0xff] %vm951_vm1, %v813_v28  ;;  %v1334_v39 = vpop.f32.mrb[22].mxu0 }
 0x2a0   :  { %v828_v40 = vadd.f32 %v1334_v39, %v1827_v27  ;;  %v822_v41 = vpop.f32.mrb[23].mxu0 }
 0x2a1   :  { %v823_v36 = vadd.f32 %v1827_v27, %v822_v41 }
 0x2a2   :  { %959 = vst.msk [vmem:[%s1996_s7 + $0x38] sm:$0xff] %vm951_vm1, %v828_v40 }
 0x2a3   :  { %958 = vst.msk [vmem:[%s1996_s7 + $0x30] sm:$0xff] %vm951_vm1, %v823_v36  ;;  %v1337_v42 = vpop.f32.mrb[24].mxu0 }
 0x2a4   :  { %v838_v43 = vadd.f32 %v1337_v42, %v1827_v27  ;;  %v832_v45 = vpop.f32.mrb[25].mxu0 }
 0x2a5   :  { %v833_v44 = vadd.f32 %v1827_v27, %v832_v45 }
 0x2a6   :  { %961 = vst.msk [vmem:[%s1996_s7 + $0x48] sm:$0xff] %vm951_vm1, %v838_v43 }
 0x2a7   :  { %960 = vst.msk [vmem:[%s1996_s7 + $0x40] sm:$0xff] %vm951_vm1, %v833_v44  ;;  %v1340_v46 = vpop.f32.mrb[26].mxu0 }
 0x2a8   :  { %v848_v47 = vadd.f32 %v1340_v46, %v1827_v27  ;;  %v842_v48 = vpop.f32.mrb[27].mxu0 }
 0x2a9   :  { %v843_v49 = vadd.f32 %v1827_v27, %v842_v48 }
 0x2aa   :  { %963 = vst.msk [vmem:[%s1996_s7 + $0x58] sm:$0xff] %vm951_vm1, %v848_v47 }
 0x2ab   :  { %962 = vst.msk [vmem:[%s1996_s7 + $0x50] sm:$0xff] %vm951_vm1, %v843_v49  ;;  %v1343_v50 = vpop.f32.mrb[28].mxu0 }
 0x2ac   :  { %v858_v51 = vadd.f32 %v1343_v50, %v1827_v27  ;;  %v852_v52 = vpop.f32.mrb[29].mxu0 }
 0x2ad   :  { %v853_v53 = vadd.f32 %v1827_v27, %v852_v52 }
 0x2ae   :  { %965 = vst.msk [vmem:[%s1996_s7 + $0x68] sm:$0xff] %vm951_vm1, %v858_v51 }
 0x2af   :  { %964 = vst.msk [vmem:[%s1996_s7 + $0x60] sm:$0xff] %vm951_vm1, %v853_v53  ;;  %v1346_v54 = vpop.f32.mrb[30].mxu0 }
 0x2b0   :  { %v868_v55 = vadd.f32 %v1346_v54, %v1827_v27  ;;  %v862_v19 = vpop.f32.mrb[31].mxu0 }
 0x2b1   :  { %v863_v57 = vadd.f32 %v1827_v27, %v862_v19 }
 0x2b2   :  { %967 = vst.msk [vmem:[%s1996_s7 + $0x78] sm:$0xff] %vm951_vm1, %v868_v55 }
 0x2b3   :  { %966 = vst.msk [vmem:[%s1996_s7 + $0x70] sm:$0xff] %vm951_vm1, %v863_v57  ;;  %v1349_v58 = vpop.f32.mrb[32].mxu0 }
 0x2b4   :  { %v878_v59 = vadd.f32 %v1349_v58, %v1827_v27  ;;  %v872_v60 = vpop.f32.mrb[33].mxu0 }
 0x2b5   :  { %v873_v61 = vadd.f32 %v1827_v27, %v872_v60 }
 0x2b6   :  { %969 = vst.msk [vmem:[%s1996_s7 + $0x88] sm:$0xff] %vm951_vm1, %v878_v59 }
 0x2b7   :  { %968 = vst.msk [vmem:[%s1996_s7 + $0x80] sm:$0xff] %vm951_vm1, %v873_v61  ;;  %v1352_v62 = vpop.f32.mrb[34].mxu0 }
 0x2b8   :  { %v888_v63 = vadd.f32 %v1352_v62, %v1827_v27  ;;  %v882_v0 = vpop.f32.mrb[35].mxu0 }
 0x2b9   :  { %v883_v1 = vadd.f32 %v1827_v27, %v882_v0 }
 0x2ba   :  { %971 = vst.msk [vmem:[%s1996_s7 + $0x98] sm:$0xff] %vm951_vm1, %v888_v63 }
 0x2bb   :  { %970 = vst.msk [vmem:[%s1996_s7 + $0x90] sm:$0xff] %vm951_vm1, %v883_v1  ;;  %v1355_v2 = vpop.f32.mrb[36].mxu0 }
 0x2bc   :  { %v898_v3 = vadd.f32 %v1355_v2, %v1827_v27  ;;  %v892_v4 = vpop.f32.mrb[37].mxu0 }
 0x2bd   :  { %v893_v5 = vadd.f32 %v1827_v27, %v892_v4 }
 0x2be   :  { %973 = vst.msk [vmem:[%s1996_s7 + $0xa8] sm:$0xff] %vm951_vm1, %v898_v3 }
 0x2bf   :  { %972 = vst.msk [vmem:[%s1996_s7 + $0xa0] sm:$0xff] %vm951_vm1, %v893_v5  ;;  %v1358_v6 = vpop.f32.mrb[38].mxu0 }
 0x2c0   :  { %v908_v7 = vadd.f32 %v1358_v6, %v1827_v27  ;;  %v902_v8 = vpop.f32.mrb[39].mxu0 }
 0x2c1   :  { %v903_v9 = vadd.f32 %v1827_v27, %v902_v8 }
 0x2c2   :  { %975 = vst.msk [vmem:[%s1996_s7 + $0xb8] sm:$0xff] %vm951_vm1, %v908_v7 }
 0x2c3   :  { %974 = vst.msk [vmem:[%s1996_s7 + $0xb0] sm:$0xff] %vm951_vm1, %v903_v9  ;;  %v1361_v10 = vpop.f32.mrb[40].mxu0 }
 0x2c4   :  { %v918_v11 = vadd.f32 %v1361_v10, %v1827_v27  ;;  %v912_v12 = vpop.f32.mrb[41].mxu0 }
 0x2c5   :  { %v913_v13 = vadd.f32 %v1827_v27, %v912_v12 }
 0x2c6   :  { %977 = vst.msk [vmem:[%s1996_s7 + $0xc8] sm:$0xff] %vm951_vm1, %v918_v11 }
 0x2c7   :  { %976 = vst.msk [vmem:[%s1996_s7 + $0xc0] sm:$0xff] %vm951_vm1, %v913_v13  ;;  %v1364_v14 = vpop.f32.mrb[42].mxu0 }
 0x2c8   :  { %v928_v15 = vadd.f32 %v1364_v14, %v1827_v27  ;;  %v922_v16 = vpop.f32.mrb[43].mxu0 }
 0x2c9   :  { %v923_v17 = vadd.f32 %v1827_v27, %v922_v16 }
 0x2ca   :  { %979 = vst.msk [vmem:[%s1996_s7 + $0xd8] sm:$0xff] %vm951_vm1, %v928_v15 }
 0x2cb   :  { %978 = vst.msk [vmem:[%s1996_s7 + $0xd0] sm:$0xff] %vm951_vm1, %v923_v17  ;;  %v1367_v18 = vpop.f32.mrb[44].mxu0 }
 0x2cc   :  { %v938_v20 = vadd.f32 %v1367_v18, %v1827_v27  ;;  %v932_v22 = vpop.f32.mrb[45].mxu0 }
 0x2cd   :  { %v933_v23 = vadd.f32 %v1827_v27, %v932_v22 }
 0x2ce   :  { %981 = vst.msk [vmem:[%s1996_s7 + $0xe8] sm:$0xff] %vm951_vm1, %v938_v20 }
 0x2cf   :  { %980 = vst.msk [vmem:[%s1996_s7 + $0xe0] sm:$0xff] %vm951_vm1, %v933_v23  ;;  %v1370_v25 = vpop.f32.mrb[46].mxu0 }
 0x2d0   :  { %v948_v26 = vadd.f32 %v1370_v25, %v1827_v27  ;;  %v942_v24 = vpop.f32.mrb[47].mxu0 }
 0x2d1   :  { %v943_v29 = vadd.f32 %v1827_v27, %v942_v24 }
 0x2d2   :  { %983 = vst.msk [vmem:[%s1996_s7 + $0xf8] sm:$0xff] %vm951_vm1, %v948_v26 }
 0x2d3   :  { %982 = vst.msk [vmem:[%s1996_s7 + $0xf0] sm:$0xff] %vm951_vm1, %v943_v29 }

</bundles_post_ra>
